<compile_context>
chip_gen: v7x
topology: tpu7x:2x2x1
jax: 0.10.0
libtpu: 0.0.40
codegen_flags: <defaults>
</compile_context>

<pallas_src>
import functools

import jax
import jax.numpy as jnp
from jax.experimental import pallas as pl
from jax.experimental.pallas import tpu as pltpu


def _round_up(x, m):
    return -(-x // m) * m


def _kl_div_kernel(logits_ref, labels_ref, partial_ref, *, batch_size, tile_rows):
    pid = pl.program_id(0)

    x = logits_ref[...]                          # (TN, C), native dtype
    labels = labels_ref[...]                     # (TN, 1) int32
    tn, c = x.shape

    # Row max + shift in the native dtype; only the shifted logits are upcast
    # to f32 (single (TN, C) f32 temporary feeding exp/log-sum and the pick).
    m = jnp.max(x, axis=1, keepdims=True)        # (TN, 1)
    xm = (x - m).astype(jnp.float32)             # (TN, C) f32

    # Shifted log-sum-exp over the class (lane) axis, in f32.
    lse_shifted = jnp.log(jnp.sum(jnp.exp(xm), axis=1, keepdims=True))     # (TN, 1)

    # Select (x[i, label_i] - m_i) with a (1, C) iota broadcast against the
    # label column — no (TN, C) iota or dense one-hot is materialized.
    class_ids = jax.lax.broadcasted_iota(jnp.int32, (1, c), 1)
    match = class_ids == labels                  # (TN, C) bool via broadcast
    picked_shifted = jnp.sum(jnp.where(match, xm, 0.0), axis=1, keepdims=True)

    # Per-row KL against a one-hot target (t*log(t) == 0):
    #   loss_i = lse_i - x[i, l_i] = lse_shifted_i - (x[i, l_i] - m_i).
    per_row = lse_shifted - picked_shifted       # (TN, 1) f32

    # Rows with out-of-range labels contribute 0 (matches jax.nn.one_hot;
    # PyTorch F.one_hot would raise) — direct bound check, no cross-lane any().
    in_range = (labels >= 0) & (labels < c)      # (TN, 1)
    # Mask rows past the true batch size (padded edge tile). This mask is
    # applied AFTER all axis=1 reductions, so garbage (even NaN/Inf) in padded
    # rows never crosses into valid rows.
    row_ids = pid * tile_rows + jax.lax.broadcasted_iota(jnp.int32, (tn, 1), 0)
    per_row = jnp.where(in_range & (row_ids < batch_size), per_row, 0.0)

    # One partial sum per tile, written lane-dense (unmasked lane stores);
    # XLA reads lane 0 only.
    tile_sum = jnp.sum(per_row, axis=0, keepdims=True)                     # (1, 1)
    partial_ref[...] = jnp.broadcast_to(tile_sum, (1, 128))


def _vmem_capacity_bytes():
    try:
        return int(pltpu.get_tpu_info().vmem_capacity_bytes)
    except Exception:
        return 64 << 20          # conservative (v7x-sized) fallback


def _choose_tile_rows(n, c, itemsize, budget_bytes):
    """Pick the batch-tile height from a VMEM byte budget (no fixed row cap).

    Per-row footprint counts the double-buffered, lane-padded logits block in
    its native dtype, ~4x block worth of in-kernel f32 temporaries (shifted
    logits, exp, select mask, headroom) and the double-buffered, 128x
    lane-padded (TN, 1) int32 labels block.
    """
    c_pad = _round_up(c, 128)
    per_row = (2 * c_pad * itemsize        # logits block x2 buffers
               + 4 * c_pad * 4             # in-kernel f32 temporaries
               + 2 * 128 * 4)              # labels block x2 buffers (lane-padded)

    # Sublane packing: 8 rows for 32-bit, 16 for bf16, 32 for int8/fp8.
    sub = 8 * max(1, 4 // max(1, itemsize))
    max_rows = max(sub, (budget_bytes // per_row) // sub * sub)

    if n <= max_rows:
        # Whole batch fits in one tile. If it is big enough, still split into
        # exactly two tiles so both v7x TensorCores get work (harmless on the
        # single-TC v5e/v6e: one extra ~0.35us grid step).
        if n >= 4 * sub:
            return _round_up(_round_up(n, 2) // 2, sub)
        return n
    return max_rows


def kl_divergence_loss(logits, labels, num_classes):
    """Pallas equivalent of KLDivergenceLoss(num_classes, reduction='batchmean')."""
    n, c = logits.shape
    assert c == num_classes

    labels2d = labels.astype(jnp.int32).reshape(n, 1)

    vmem_cap = _vmem_capacity_bytes()
    budget = vmem_cap // 4               # target for blocks + temporaries
    vmem_limit = vmem_cap // 2           # scoped-VMEM limit handed to Mosaic

    tn = _choose_tile_rows(n, c, logits.dtype.itemsize, budget)
    num_tiles = pl.cdiv(n, tn)

    kernel = functools.partial(_kl_div_kernel, batch_size=n, tile_rows=tn)

    partials = pl.pallas_call(
        kernel,
        out_shape=jax.ShapeDtypeStruct((num_tiles, 128), jnp.float32),
        grid=(num_tiles,),
        in_specs=[
            pl.BlockSpec((tn, c), lambda i: (i, 0)),   # logits tile (native dtype)
            pl.BlockSpec((tn, 1), lambda i: (i, 0)),   # labels tile (int32)
        ],
        out_specs=pl.BlockSpec((1, 128), lambda i: (i, 0)),
        compiler_params=pltpu.CompilerParams(
            dimension_semantics=("parallel",),          # tiles are independent
            vmem_limit_bytes=int(vmem_limit)),
    )(logits, labels2d)

    # Tiny final reduce (lane 0 of each tile) + batchmean divide in XLA.
    return jnp.sum(partials[:, 0]) / jnp.float32(n)


def _reference_loss(logits, labels, num_classes):
    log_probs = jax.nn.log_softmax(logits.astype(jnp.float32), axis=1)
    onehot = jax.nn.one_hot(labels, num_classes, dtype=jnp.float32)
    kl = jnp.where(onehot > 0, onehot * (0.0 - log_probs), 0.0)
    return jnp.sum(kl) / logits.shape[0]


if __name__ == "__main__":
    num_classes = 32
    batch = 8

    key = jax.random.PRNGKey(0)
    k_logits, k_labels = jax.random.split(key)
    logits = jax.random.normal(k_logits, (batch, num_classes), dtype=jnp.float32)
    labels = jax.random.randint(k_labels, (batch,), 0, num_classes, dtype=jnp.int32)

    loss_fn = jax.jit(functools.partial(kl_divergence_loss, num_classes=num_classes))
    loss = loss_fn(logits, labels)
    jax.block_until_ready(loss)

    ref = _reference_loss(logits, labels, num_classes)
    assert jnp.allclose(loss, ref, rtol=1e-5, atol=1e-5), (loss, ref)

    # bf16 logits path (native-dtype DMA + shift, f32 exp/log-sum inside).
    loss_bf16 = loss_fn(logits.astype(jnp.bfloat16), labels)
    jax.block_until_ready(loss_bf16)
    assert jnp.allclose(loss_bf16, ref, rtol=3e-2, atol=3e-2), (loss_bf16, ref)

    # Multi-tile case (exercises >1 grid step, the padded edge tile and a
    # non-128-multiple class count).
    n2, c2 = 300, 160
    k1, k2 = jax.random.split(jax.random.PRNGKey(1))
    logits2 = jax.random.normal(k1, (n2, c2), dtype=jnp.float32)
    labels2 = jax.random.randint(k2, (n2,), 0, c2, dtype=jnp.int32)
    loss2 = jax.jit(functools.partial(kl_divergence_loss, num_classes=c2))(
        logits2, labels2)
    jax.block_until_ready(loss2)
    ref2 = _reference_loss(logits2, labels2, c2)
    assert jnp.allclose(loss2, ref2, rtol=1e-5, atol=1e-5), (loss2, ref2)

    print("KERNEL_OK")
</pallas_src>

<mosaic_0001>
module attributes {stable_mosaic.version = 11 : i64} {
  func.func @_kl_div_kernel(%arg0: i32, %arg1: memref<8x32xf32, #tpu.memory_space<vmem>>, %arg2: memref<8x1xi32, #tpu.memory_space<vmem>>, %arg3: memref<1x128xf32, #tpu.memory_space<vmem>>) attributes {dimension_semantics = [#tpu.dimension_semantics<parallel>], iteration_bounds = array<i64: 1>, scalar_prefetch = 0 : i64, scratch_operands = 0 : i64, tpu.core_type = #tpu.core_type<tc>, window_params = [{transform_indices = @transform_0, window_bounds = array<i64: 8, 32>}, {transform_indices = @transform_1, window_bounds = array<i64: 8, 1>}, {transform_indices = @transform_2, window_bounds = array<i64: 1, 128>}]} {
    %c0 = arith.constant 0 : index
    %c0_0 = arith.constant 0 : index
    %0 = vector.load %arg1[%c0, %c0_0] : memref<8x32xf32, #tpu.memory_space<vmem>>, vector<8x32xf32>
    %c0_1 = arith.constant 0 : index
    %c0_2 = arith.constant 0 : index
    %1 = vector.load %arg2[%c0_1, %c0_2] : memref<8x1xi32, #tpu.memory_space<vmem>>, vector<8x1xi32>
    %cst = arith.constant dense<0xFF800000> : vector<8xf32>
    %2 = vector.multi_reduction <maximumf>, %0, %cst [1] : vector<8x32xf32> to vector<8xf32>
    %3 = vector.shape_cast %2 : vector<8xf32> to vector<8x1xf32>
    %4 = vector.broadcast %3 : vector<8x1xf32> to vector<8x32xf32>
    %5 = arith.subf %0, %4 : vector<8x32xf32>
    %6 = math.exp %5 : vector<8x32xf32>
    %cst_3 = arith.constant dense<0.000000e+00> : vector<8xf32>
    %7 = vector.multi_reduction <add>, %6, %cst_3 [1] : vector<8x32xf32> to vector<8xf32>
    %8 = vector.shape_cast %7 : vector<8xf32> to vector<8x1xf32>
    %9 = math.log %8 : vector<8x1xf32>
    %10 = tpu.iota {dimensions = array<i32: 1>} : vector<1x32xi32>
    %11 = vector.broadcast %10 : vector<1x32xi32> to vector<8x32xi32>
    %12 = vector.broadcast %1 : vector<8x1xi32> to vector<8x32xi32>
    %13 = arith.cmpi eq, %11, %12 : vector<8x32xi32>
    %cst_4 = arith.constant 0.000000e+00 : f32
    %14 = vector.broadcast %cst_4 : f32 to vector<8x32xf32>
    %15 = arith.select %13, %5, %14 : vector<8x32xi1>, vector<8x32xf32>
    %cst_5 = arith.constant dense<0.000000e+00> : vector<8xf32>
    %16 = vector.multi_reduction <add>, %15, %cst_5 [1] : vector<8x32xf32> to vector<8xf32>
    %17 = vector.shape_cast %16 : vector<8xf32> to vector<8x1xf32>
    %18 = arith.subf %9, %17 : vector<8x1xf32>
    %c0_i32 = arith.constant 0 : i32
    %19 = vector.broadcast %c0_i32 : i32 to vector<8x1xi32>
    %20 = arith.cmpi sge, %1, %19 : vector<8x1xi32>
    %c32_i32 = arith.constant 32 : i32
    %21 = vector.broadcast %c32_i32 : i32 to vector<8x1xi32>
    %22 = arith.cmpi slt, %1, %21 : vector<8x1xi32>
    %23 = arith.andi %20, %22 : vector<8x1xi1>
    %c8_i32 = arith.constant 8 : i32
    %24 = arith.muli %arg0, %c8_i32 : i32
    %25 = tpu.iota {dimensions = array<i32: 0>} : vector<8x1xi32>
    %26 = vector.broadcast %24 : i32 to vector<8x1xi32>
    %27 = arith.addi %26, %25 : vector<8x1xi32>
    %c8_i32_6 = arith.constant 8 : i32
    %28 = vector.broadcast %c8_i32_6 : i32 to vector<8x1xi32>
    %29 = arith.cmpi slt, %27, %28 : vector<8x1xi32>
    %30 = arith.andi %23, %29 : vector<8x1xi1>
    %cst_7 = arith.constant 0.000000e+00 : f32
    %31 = vector.broadcast %cst_7 : f32 to vector<8x1xf32>
    %32 = arith.select %30, %18, %31 : vector<8x1xi1>, vector<8x1xf32>
    %cst_8 = arith.constant dense<0.000000e+00> : vector<1xf32>
    %33 = vector.multi_reduction <add>, %32, %cst_8 [0] : vector<8x1xf32> to vector<1xf32>
    %34 = vector.shape_cast %33 : vector<1xf32> to vector<1x1xf32>
    %35 = vector.shape_cast %34 : vector<1x1xf32> to vector<1x1xf32>
    %36 = vector.broadcast %35 : vector<1x1xf32> to vector<1x128xf32>
    %c0_9 = arith.constant 0 : index
    %c0_10 = arith.constant 0 : index
    %37 = vector.load %arg3[%c0_9, %c0_10] : memref<1x128xf32, #tpu.memory_space<vmem>>, vector<1x128xf32>
    tpu.vector_store %arg3[%c0_9, %c0_10], %36 {strides = array<i32>} : memref<1x128xf32, #tpu.memory_space<vmem>>, vector<1x128xf32>,
    return
  }
  func.func @transform_0(%arg0: i32) -> (i32, i32) {
    %c0_i32 = arith.constant 0 : i32
    %c0_i32_0 = arith.constant 0 : i32
    return %arg0, %c0_i32 : i32, i32
  }
  func.func @transform_1(%arg0: i32) -> (i32, i32) {
    %c0_i32 = arith.constant 0 : i32
    %c0_i32_0 = arith.constant 0 : i32
    return %arg0, %c0_i32 : i32, i32
  }
  func.func @transform_2(%arg0: i32) -> (i32, i32) {
    %c0_i32 = arith.constant 0 : i32
    %c0_i32_0 = arith.constant 0 : i32
    return %arg0, %c0_i32 : i32, i32
  }
}

</mosaic_0001>

<bundles_post_ra>
// kernel: kl_divergence_loss.1
= control target key start
LH: loop header
LB: loop body
LE: loop exit
PB: predicated region body
PF: predicated region fallthrough
CT: control target
= control target key end

     0   :  { %vm13_vm0 = vcmask 261120   ;;  %v72_v1 = vmov 0   ;;  %v25_v7 = vlaneseq  ;;  %vm47_vm5 = vcmask 7168   ;;  %s100_s0 = inlined_call_operand.vmem [shape: f32[8,32], index: 0, kind: input, shape index: {}]   ;;  %s101_s1 = inlined_call_operand.vmem [shape: s32[8,1], index: 1, kind: input, shape index: {}]   ;;  %s102_s2 = inlined_call_operand.vmem [shape: f32[1,128], index: 2, kind: output, shape index: {}]  }
   0x1   :  { %v11_v0 = vld [vmem:[%s100_s0] sm:$0xff]  ;;  %66 = vset.pattern.permute.xlu0 %v72_v1  ;;  %67 = vset.pattern.permute.xlu1 %v72_v1 }
   0x2   :  { %v14_v2 = vsel %vm13_vm0, %v11_v0, -inf  ;;  %v12_v3 = vld [vmem:[%s101_s1] sm:$0xff]  ;;  %v26_v8 = vand.u32 127, %v25_v7 }
   0x3   :  { %15 = vmax.xlane.f32.xlu0 %v14_v2  ;;  %vm36_vm2 = vcmp.ge.s32.totalorder %v12_v3, 0  ;;  %vm37_vm3 = vcmp.lt.s32.totalorder %v12_v3, 32 }
   0x4   :  { %vm38_vm4 = vmand %vm36_vm2, %vm37_vm3 }
  0x19   :  { %28 = vperm.xlu0 %66, %v12_v3  }
  0x90   :  { %v16_v4 = vpop.xlane.xlu0 %15 }
  0x91   :  { %v17_v5 = vsub.f32 %v11_v0, %v16_v4 }
  0x93   :  { %v18_v6 = vmul.f32 1.442695, %v17_v5 }
  0x95   :  { %68 = vpow2.f32 %v18_v6 }
  0x98   :  { %v29_v9 = vpop.permute.xlu0 %28 }
  0x99   :  { %vm30_vm1 = vcmp.eq.s32.totalorder %v26_v8, %v29_v9 }
  0x9a   :  { %v31_v12 = vsel %vm30_vm1, %v17_v5, 0.0 }
  0x9b   :  { %v32_v13 = vsel %vm13_vm0, %v31_v12, 0.0 }
  0x9f   :  { %v69_v10 = vpop.eup %68 }
  0xa0   :  { %v20_v11 = vsel %vm13_vm0, %v69_v10, 0.0 }
  0xa1   :  { %21 = vadd.xlane.f32.xlu1 %v20_v11 }
  0xa5   :  { %33 = vadd.xlane.f32.xlu1 %v32_v13 }
 0x12e   :  { %v22_v14 = vpop.xlane.xlu1 %21 }
 0x12f   :  { %70 = vlog2.f32 %v22_v14 }
 0x132   :  { %v34_v17 = vpop.xlane.xlu1 %33 }
 0x139   :  { %v71_v15 = vpop.eup %70 }
 0x13a   :  { %v24_v16 = vmul.f32 0.6931472, %v71_v15 }
 0x13c   :  { %v35_v18 = vsub.f32 %v24_v16, %v34_v17 }
 0x13e   :  { %v46_v19 = vsel %vm38_vm4, %v35_v18, 0.0 }
 0x13f   :  { %v48_v20 = vsel %vm47_vm5, %v46_v19, 0.0 }
 0x140   :  { %v49_v21 = vrot.slane %v48_v20, 4 }
 0x142   :  { %v50_v22 = vadd.f32 %v49_v21, %v48_v20 }
 0x144   :  { %v51_v23 = vrot.slane %v50_v22, 2 }
 0x146   :  { %v52_v24 = vadd.f32 %v51_v23, %v50_v22 }
 0x148   :  { %v53_v25 = vrot.slane %v52_v24, 1 }
 0x14a   :  { %v54_v26 = vadd.f32 %v53_v25, %v52_v24 }
 0x14c   :  { %57 = vperm.xlu1 %67, %v54_v26  }
 0x1cb   :  { %v58_v27 = vpop.permute.xlu1 %57 }
 0x1cc   :  { %60 = vst [vmem:[%s102_s2] sm:$0x1] %v58_v27 }

</bundles_post_ra>
